<compile_context>
chip_gen: v5e
topology: v5e:2x2
jax: 0.10.0
libtpu: 0.0.40
codegen_flags: <defaults>
</compile_context>

<pallas_src>
import jax
import jax.numpy as jnp
from jax.experimental import pallas as pl
from jax.experimental.pallas import tpu as pltpu

_F32 = 4
_NEG_INF = -1e30  # finite "minus infinity" -> no inf-inf NaN hazards


# --------------------------------------------------------------------------
# Kernels
# --------------------------------------------------------------------------
def _attention_kernel(x_ref, w_ref, o_ref):
    """Single-pass kernel: whole sequence resident per batch tile."""
    x = x_ref[...]                                   # (TB, S, D) storage dtype
    w = w_ref[...].astype(x.dtype)                   # (1, D)

    # energy[b, s] = sum_d x[b,s,d] * w[d] : VPU multiply in storage dtype,
    # f32 accumulation on the XLU reduce.  (Linear bias cancels in softmax.)
    energy = jnp.sum(x * w[None, :, :], axis=-1, keepdims=True,
                     dtype=jnp.float32)              # (TB, S, 1)

    # Numerically stable softmax over the sequence axis, normalization deferred.
    m = jnp.max(energy, axis=1, keepdims=True)       # (TB, 1, 1)
    pexp = jnp.exp(energy - m)                       # (TB, S, 1) f32
    denom = jnp.sum(pexp, axis=1, keepdims=True)     # (TB, 1, 1)

    # Unnormalized context: multiply in storage dtype, accumulate in f32,
    # then one per-row reciprocal scale.
    ctx = jnp.sum(pexp.astype(x.dtype) * x, axis=1, dtype=jnp.float32)  # (TB, D)
    inv = pl.reciprocal(denom[:, 0, :], approx=False)                   # (TB, 1)
    o_ref[...] = (ctx * inv).astype(o_ref.dtype)


def _make_seq_tiled_kernel(seq_len, seq_tile):
    """Online-softmax accumulator kernel for grids tiled over the sequence."""
    need_mask = (seq_len % seq_tile) != 0

    def kernel(x_ref, w_ref, o_ref, m_sc, l_sc, acc_sc):
        j = pl.program_id(1)

        @pl.when(j == 0)
        def _():
            m_sc[...] = jnp.full(m_sc.shape, _NEG_INF, m_sc.dtype)
            l_sc[...] = jnp.zeros(l_sc.shape, l_sc.dtype)
            acc_sc[...] = jnp.zeros(acc_sc.shape, acc_sc.dtype)

        x = x_ref[...]                               # (TB, TS, D)
        w = w_ref[...].astype(x.dtype)               # (1, D)
        energy = jnp.sum(x * w[None, :, :], axis=-1,
                         dtype=jnp.float32)          # (TB, TS)
        if need_mask:
            col = jax.lax.broadcasted_iota(jnp.int32, energy.shape, 1) + j * seq_tile
            energy = jnp.where(col < seq_len, energy, _NEG_INF)

        m_prev = m_sc[...]                                            # (TB, 1)
        m_new = jnp.maximum(m_prev, jnp.max(energy, axis=-1, keepdims=True))
        alpha = jnp.exp(m_prev - m_new)                               # (TB, 1)
        pexp = jnp.exp(energy - m_new)                                # (TB, TS)
        l_sc[...] = alpha * l_sc[...] + jnp.sum(pexp, axis=-1, keepdims=True)
        weighted = pexp[:, :, None].astype(x.dtype) * x               # (TB, TS, D)
        acc_sc[...] = alpha * acc_sc[...] + jnp.sum(weighted, axis=1,
                                                    dtype=jnp.float32)
        m_sc[...] = m_new

        @pl.when(j == pl.num_programs(1) - 1)
        def _():
            inv = pl.reciprocal(l_sc[...], approx=False)              # (TB, 1)
            o_ref[...] = (acc_sc[...] * inv).astype(o_ref.dtype)

    return kernel


# --------------------------------------------------------------------------
# Wrapper
# --------------------------------------------------------------------------
def _device_params():
    """HBM-bandwidth / VMEM / core-count aware tiling targets."""
    kind = ""
    try:
        kind = jax.devices()[0].device_kind.lower()
    except Exception:
        pass
    if "v7" in kind:   # 3.2 TB/s, 64 MiB VMEM, 2 TC/chip
        return {"target_bytes": 16 << 20, "vmem_budget": 40 << 20, "num_cores": 2}
    if "v6" in kind:   # 1.4 TB/s, 128 MiB VMEM, 1 TC
        return {"target_bytes": 8 << 20, "vmem_budget": 96 << 20, "num_cores": 1}
    if "v5" in kind:   # 0.8 TB/s, 128 MiB VMEM, 1 TC
        return {"target_bytes": 4 << 20, "vmem_budget": 96 << 20, "num_cores": 1}
    # Unknown chip: conservative (safe for 64 MiB VMEM, assume 2 cores).
    return {"target_bytes": 8 << 20, "vmem_budget": 40 << 20, "num_cores": 2}


def _round_up(x, m):
    return -(-x // m) * m


def _round_down_min(x, m):
    return max(m, (x // m) * m)


def attention_forward(encoder_outputs, w, b=None, *, batch_tile=None, seq_tile=None):
    """encoder_outputs: (B, S, D=2H); w: (1, D), (D, 1) or (D,); bias b is
    dropped (softmax-invariant).  Returns (B, 1, D) like the PyTorch module."""
    B, S, D = encoder_outputs.shape
    if w.ndim == 1:
        w = w.reshape(1, -1)
    elif w.shape == (D, 1):
        w = w.T
    w = w.reshape(1, D)

    x = encoder_outputs
    dtype = x.dtype
    itemsize = jnp.dtype(dtype).itemsize
    pack = max(8, 32 // itemsize)        # sublane pack: f32 -> 8, bf16 -> 16, i8 -> 32
    p = _device_params()

    # Per-batch-row costs: HBM stream bytes and conservative VMEM footprint
    # (double-buffered input + ~3 f32 elementwise temporaries + output).
    row_in = S * D * itemsize
    row_vmem = 2 * row_in + 3 * S * D * _F32 + 2 * D * _F32

    # ---------------- tile selection ----------------
    if seq_tile is not None:
        TS = _round_down_min(int(seq_tile), pack)
        if batch_tile is not None:
            TB = int(batch_tile)
        else:
            per_row = TS * (2 * D * itemsize + 3 * D * _F32) + 2 * D * _F32
            TB = min(_round_up(B, pack),
                     _round_down_min(p["vmem_budget"] // max(1, per_row), pack))
        use_seq = TS < S
        if not use_seq:
            TS = S
    elif batch_tile is not None:
        TB, TS, use_seq = int(batch_tile), S, False
    else:
        vmem_rows = max(1, p["vmem_budget"] // row_vmem)
        tgt_rows = max(1, p["target_bytes"] // max(1, row_in))
        cap = min(vmem_rows, tgt_rows)
        if p["num_cores"] > 1 and B >= 2 * pack:
            # Ensure >= num_cores grid steps so "parallel" actually splits TCs.
            half = _round_down_min(_round_up(B, p["num_cores"]) // p["num_cores"], pack)
            cap = min(cap, half)
        if cap >= B:
            TB, TS, use_seq = B, S, False
        elif vmem_rows >= pack:
            TB, TS, use_seq = _round_down_min(cap, pack), S, False
        else:
            # Even a minimum batch tile with the full sequence overflows the
            # VMEM budget: tile the sequence with online-softmax accumulation.
            TB = pack
            per_row = TB * (2 * D * itemsize + 3 * D * _F32)
            TS = min(S,
                     _round_down_min(p["vmem_budget"] // max(1, per_row), pack),
                     _round_down_min(p["target_bytes"] // max(1, TB * D * itemsize), pack))
            use_seq = TS < S
            if not use_seq:
                TS = S

    # ---------------- padding (ragged B / S) ----------------
    Bp = _round_up(B, TB)
    Sp = _round_up(S, TS) if use_seq else S
    if Bp != B or Sp != S:
        x = jnp.pad(x, ((0, Bp - B), (0, Sp - S), (0, 0)))

    # ---------------- VMEM budget (includes in-kernel f32 temporaries) -------
    tile_in = TB * TS * D * itemsize
    tile_out = TB * D * itemsize
    temps = 3 * TB * TS * D * _F32
    scr = (2 * TB * 128 + TB * max(D, 128)) * _F32 if use_seq else 0
    vmem_limit = int(2 * tile_in + 2 * tile_out + temps + scr + (2 << 20))
    vmem_limit = min(max(vmem_limit, 16 << 20), p["vmem_budget"] + (8 << 20))

    # ---------------- pallas_call ----------------
    if not use_seq:
        out = pl.pallas_call(
            _attention_kernel,
            out_shape=jax.ShapeDtypeStruct((Bp, D), dtype),
            grid_spec=pltpu.PrefetchScalarGridSpec(
                num_scalar_prefetch=0,
                grid=(Bp // TB,),
                in_specs=[
                    pl.BlockSpec((TB, Sp, D), lambda i: (i, 0, 0)),
                    pl.BlockSpec((1, D), lambda i: (0, 0)),
                ],
                out_specs=pl.BlockSpec((TB, D), lambda i: (i, 0)),
            ),
            compiler_params=pltpu.CompilerParams(
                dimension_semantics=("parallel",),
                vmem_limit_bytes=vmem_limit,
            ),
        )(x, w)
    else:
        kernel = _make_seq_tiled_kernel(S, TS)
        out = pl.pallas_call(
            kernel,
            out_shape=jax.ShapeDtypeStruct((Bp, D), dtype),
            grid_spec=pltpu.PrefetchScalarGridSpec(
                num_scalar_prefetch=0,
                grid=(Bp // TB, Sp // TS),
                in_specs=[
                    pl.BlockSpec((TB, TS, D), lambda i, j: (i, j, 0)),
                    pl.BlockSpec((1, D), lambda i, j: (0, 0)),
                ],
                out_specs=pl.BlockSpec((TB, D), lambda i, j: (i, 0)),
                scratch_shapes=[
                    pltpu.VMEM((TB, 1), jnp.float32),   # running max m
                    pltpu.VMEM((TB, 1), jnp.float32),   # running denom l
                    pltpu.VMEM((TB, D), jnp.float32),   # running weighted sum
                ],
            ),
            compiler_params=pltpu.CompilerParams(
                dimension_semantics=("parallel", "arbitrary"),
                vmem_limit_bytes=vmem_limit,
            ),
        )(x, w)

    return out[:B, None, :]             # (B, 1, D)


def attention_reference(encoder_outputs, w, b):
    """Pure-JAX reference of the PyTorch forward (bias included)."""
    energy = jnp.einsum("bsd,od->bso", encoder_outputs, w)[..., 0] + b[0]
    attn_w = jax.nn.softmax(energy, axis=1)[..., None]             # (B, S, 1)
    return jnp.sum(encoder_outputs * attn_w, axis=1)[:, None]      # (B, 1, D)


if __name__ == "__main__":
    # Toy shapes consistent with the module: hidden_dim=16 -> D = 2*hidden = 32.
    hidden_dim = 16
    B, S, D = 2, 8, hidden_dim * 2

    key = jax.random.PRNGKey(0)
    kx, kw, kb = jax.random.split(key, 3)

    # torch nn.Linear(2H, 1): weight (1, 2H), bias (1,)
    w = jax.random.normal(kw, (1, D), dtype=jnp.float32) * 0.1
    b = jax.random.normal(kb, (1,), dtype=jnp.float32) * 0.1
    x = jax.random.normal(kx, (B, S, D), dtype=jnp.float32)

    out = jax.block_until_ready(attention_forward(x, w, b))
    ref = attention_reference(x, w, b)
    assert out.shape == (B, 1, D), out.shape
    assert jnp.allclose(out, ref, atol=1e-5, rtol=1e-5), "mismatch vs reference"

    # Also exercise the sequence-tiled online-softmax path (ragged S needing
    # masking, ragged B needing sublane padding) so the fallback is verified.
    B2, S2 = 4, 37
    x2 = jax.random.normal(jax.random.PRNGKey(1), (B2, S2, D), dtype=jnp.float32)
    out2 = jax.block_until_ready(attention_forward(x2, w, b, seq_tile=16))
    ref2 = attention_reference(x2, w, b)
    assert out2.shape == (B2, 1, D), out2.shape
    assert jnp.allclose(out2, ref2, atol=1e-5, rtol=1e-5), "mismatch (seq-tiled)"

    print("KERNEL_OK")
</pallas_src>

<mosaic_0001>
module attributes {stable_mosaic.version = 11 : i64} {
  func.func @_attention_kernel(%arg0: i32, %arg1: memref<2x8x32xf32, #tpu.memory_space<vmem>>, %arg2: memref<1x32xf32, #tpu.memory_space<vmem>>, %arg3: memref<2x32xf32, #tpu.memory_space<vmem>>) attributes {dimension_semantics = [#tpu.dimension_semantics<parallel>], iteration_bounds = array<i64: 1>, scalar_prefetch = 0 : i64, scratch_operands = 0 : i64, tpu.core_type = #tpu.core_type<tc>, window_params = [{transform_indices = @transform_0, window_bounds = array<i64: 2, 8, 32>}, {pipeline_mode = #tpu.pipeline_mode<synchronous>, transform_indices = @transform_1, window_bounds = array<i64: 1, 32>}, {transform_indices = @transform_2, window_bounds = array<i64: 2, 32>}]} {
    %c0 = arith.constant 0 : index
    %c0_0 = arith.constant 0 : index
    %c0_1 = arith.constant 0 : index
    %0 = vector.load %arg1[%c0, %c0_0, %c0_1] : memref<2x8x32xf32, #tpu.memory_space<vmem>>, vector<2x8x32xf32>
    %c0_2 = arith.constant 0 : index
    %c0_3 = arith.constant 0 : index
    %1 = vector.load %arg2[%c0_2, %c0_3] : memref<1x32xf32, #tpu.memory_space<vmem>>, vector<1x32xf32>
    %2 = vector.shape_cast %1 : vector<1x32xf32> to vector<1x1x32xf32>
    %3 = vector.broadcast %2 : vector<1x1x32xf32> to vector<2x8x32xf32>
    %4 = arith.mulf %0, %3 : vector<2x8x32xf32>
    %cst = arith.constant dense<0.000000e+00> : vector<2x8xf32>
    %5 = vector.multi_reduction <add>, %4, %cst [2] : vector<2x8x32xf32> to vector<2x8xf32>
    %6 = vector.shape_cast %5 : vector<2x8xf32> to vector<2x8x1xf32>
    %cst_4 = arith.constant dense<0xFF800000> : vector<2x1xf32>
    %7 = vector.multi_reduction <maximumf>, %6, %cst_4 [1] : vector<2x8x1xf32> to vector<2x1xf32>
    %8 = vector.shape_cast %7 : vector<2x1xf32> to vector<2x1x1xf32>
    %9 = vector.broadcast %8 : vector<2x1x1xf32> to vector<2x8x1xf32>
    %10 = arith.subf %6, %9 : vector<2x8x1xf32>
    %11 = math.exp %10 : vector<2x8x1xf32>
    %cst_5 = arith.constant dense<0.000000e+00> : vector<2x1xf32>
    %12 = vector.multi_reduction <add>, %11, %cst_5 [1] : vector<2x8x1xf32> to vector<2x1xf32>
    %13 = vector.shape_cast %12 : vector<2x1xf32> to vector<2x1x1xf32>
    %14 = vector.broadcast %11 : vector<2x8x1xf32> to vector<2x8x32xf32>
    %15 = arith.mulf %14, %0 : vector<2x8x32xf32>
    %cst_6 = arith.constant dense<0.000000e+00> : vector<2x32xf32>
    %16 = vector.multi_reduction <add>, %15, %cst_6 [1] : vector<2x8x32xf32> to vector<2x32xf32>
    %17 = vector.shape_cast %13 : vector<2x1x1xf32> to vector<2x1xf32>
    %18 = tpu.reciprocal %17 : vector<2x1xf32> -> vector<2x1xf32>
    %19 = vector.broadcast %18 : vector<2x1xf32> to vector<2x32xf32>
    %20 = arith.mulf %16, %19 : vector<2x32xf32>
    %c0_7 = arith.constant 0 : index
    %c0_8 = arith.constant 0 : index
    %21 = vector.load %arg3[%c0_7, %c0_8] : memref<2x32xf32, #tpu.memory_space<vmem>>, vector<2x32xf32>
    tpu.vector_store %arg3[%c0_7, %c0_8], %20 {strides = array<i32>} : memref<2x32xf32, #tpu.memory_space<vmem>>, vector<2x32xf32>,
    return
  }
  func.func @transform_0(%arg0: i32) -> (i32, i32, i32) {
    %c0_i32 = arith.constant 0 : i32
    %c0_i32_0 = arith.constant 0 : i32
    %c0_i32_1 = arith.constant 0 : i32
    return %arg0, %c0_i32, %c0_i32_0 : i32, i32, i32
  }
  func.func @transform_1(%arg0: i32) -> (i32, i32) {
    %c0_i32 = arith.constant 0 : i32
    %c0_i32_0 = arith.constant 0 : i32
    %c0_i32_1 = arith.constant 0 : i32
    return %c0_i32, %c0_i32_0 : i32, i32
  }
  func.func @transform_2(%arg0: i32) -> (i32, i32) {
    %c0_i32 = arith.constant 0 : i32
    %c0_i32_0 = arith.constant 0 : i32
    return %arg0, %c0_i32 : i32, i32
  }
}

</mosaic_0001>

<bundles_post_ra>
// kernel: tpu_custom_call.1
= control target key start
LH: loop header
LB: loop body
LE: loop exit
PB: predicated region body
PF: predicated region fallthrough
CT: control target
= control target key end

     0   :  { %7 = vsyncpa [#allocation3], 0  ;;  %s283_s0 = inlined_call_operand.hbm [shape: f32[2,8,32], index: 0, kind: input, shape index: {}]   ;;  %s284_s1 = inlined_call_operand.hbm [shape: f32[1,32], index: 1, kind: input, shape index: {}]   ;;  %s285_s2 = inlined_call_operand.hbm [shape: f32[2,32], index: 2, kind: output, shape index: {}]  }
   0x1   :  { %8 = vsyncpa [#allocation6], 0 }
   0x2   :  { %9 = vsyncpa [#allocation4], 0  ;;  %s14_s11 = sshll.u32 %s283_s0, 4  ;;  %s250_s12 = smov [#allocation2]   ;;  %s15_s11 = int_to_ptr.hbm [resolvable:$true] %s14_s11 }
   0x3   :  { %s16_s13 = sshll.u32 %s250_s12, 4  ;;  %s28_s16 = sshll.u32 %s284_s1, 4  ;;  %s17_s13 = int_to_ptr.vmem [resolvable:$true] %s16_s13  ;;  %s29_s16 = int_to_ptr.hbm [resolvable:$true] %s28_s16 }
   0x4   :  { %s251_s17 = smov 128   ;;  %s252_s18 = smov 8  }
   0x5   :  { %22 = dma.hbm_to_vmem [thread:$0]  %s15_s11, 256, %s17_s13, [#allocation3], %s251_s17, %s251_s17, %s252_s18  }
   0x6   :  { %s253_s19 = smov [#allocation5]  }
   0x7   :  { %s30_s20 = sshll.u32 %s253_s19, 4  ;;  %s31_s20 = int_to_ptr.vmem [resolvable:$true] %s30_s20 }
   0x8   :  { %33 = dma.hbm_to_vmem [thread:$0]  %s29_s16, 16, %s31_s20, [#allocation6]  }
   0x9   :  { %244 = dma.done.wait [#allocation3], 256  }
   0xa   :  { %245 = vsyncadd [#allocation3], 4294967040 }
   0xb   :  { %246 = dma.done.wait [#allocation6], 16  }
   0xc   :  { %247 = vsyncadd [#allocation6], 4294967280  ;;  %v42_v0 = vld [vmem:[#allocation2] sm:$0xff]  ;;  %v163_v1 = vld [vmem:[#allocation5] ss:$0 sm:$0xff]  ;;  %vm50_vm0 = vcmask 261120  }
   0xd   :  { %v48_v2 = vmul.f32 %v163_v1, %v42_v0  ;;  %v43_v3 = vld [vmem:[#allocation2 + $0x8] sm:$0xff]  ;;  %s254_s0 = smov [#allocation7]   ;;  %s147_s23 = sshll.u32 %s285_s2, 4  ;;  %vm135_vm9 = vcmask 1041409   ;;  %vm138_vm10 = vcmask 254976   ;;  %s148_s23 = int_to_ptr.hbm [resolvable:$true] %s147_s23 }
   0xe   :  { %v49_v5 = vmul.f32 %v163_v1, %v43_v3  ;;  %s145_s1 = sshll.u32 %s254_s0, 4  ;;  %s146_s1 = int_to_ptr.vmem [resolvable:$true] %s145_s1 }
   0xf   :  { %v51_v4 = vsel %vm50_vm0, %v48_v2, 0.0 }
  0x10   :  { %52 = vadd.xlane.f32.xlu0 %v51_v4  ;;  %v54_v6 = vsel %vm50_vm0, %v49_v5, 0.0 }
  0x18   :  { %55 = vadd.xlane.f32.xlu0 %v54_v6 }
  0x83   :  { %v53_v7 = vpop.xlane.xlu0 %52 }
  0x84   :  { %v57_v8 = vrot.slane %v53_v7, 4 }
  0x86   :  { %v58_v9 = vmax.f32 %v53_v7, %v57_v8 }
  0x88   :  { %v59_v10 = vrot.slane %v58_v9, 2 }
  0x8a   :  { %v60_v11 = vmax.f32 %v58_v9, %v59_v10 }
  0x8b   :  { %v56_v12 = vpop.xlane.xlu0 %55 }
  0x8c   :  { %v61_v13 = vrot.slane %v60_v11, 1  ;;  %v63_v14 = vrot.slane %v56_v12, 4 }
  0x8e   :  { %v62_v15 = vmax.f32 %v60_v11, %v61_v13  ;;  %v64_v16 = vmax.f32 %v56_v12, %v63_v14 }
  0x90   :  { %v69_v17 = vsub.f32 %v53_v7, %v62_v15  ;;  %v65_v18 = vrot.slane %v64_v16, 2 }
  0x92   :  { %v71_v19 = vmul.f32 1.442695, %v69_v17  ;;  %v66_v20 = vmax.f32 %v64_v16, %v65_v18 }
  0x94   :  { %164 = vpow2.f32 %v71_v19  ;;  %v67_v21 = vrot.slane %v66_v20, 1 }
  0x96   :  { %v68_v22 = vmax.f32 %v66_v20, %v67_v21 }
  0x98   :  { %v70_v23 = vsub.f32 %v56_v12, %v68_v22 }
  0x9a   :  { %v165_v24 = vpop.eup %164  ;;  %v73_v25 = vmul.f32 1.442695, %v70_v23 }
  0x9b   :  { %v75_v26 = vrot.slane %v165_v24, 4  ;;  %v87_v31 = vmul.f32 %v165_v24, %v42_v0 }
  0x9c   :  { %166 = vpow2.f32 %v73_v25 }
  0x9d   :  { %v76_v27 = vadd.f32 %v165_v24, %v75_v26  ;;  %v89_v37 = vsel %vm50_vm0, %v87_v31, 0.0 }
  0x9e   :  { %v90_v41 = vrot.slane %v89_v37, 4 }
  0x9f   :  { %v77_v28 = vrot.slane %v76_v27, 2 }
  0xa0   :  { %v91_v46 = vadd.f32 %v90_v41, %v89_v37 }
  0xa1   :  { %v78_v29 = vadd.f32 %v77_v28, %v76_v27 }
  0xa2   :  { %v167_v30 = vpop.eup %166  ;;  %v92_v50 = vrot.slane %v91_v46, 2 }
  0xa3   :  { %v79_v32 = vrot.slane %v78_v29, 1  ;;  %v81_v33 = vrot.slane %v167_v30, 4  ;;  %v88_v34 = vmul.f32 %v167_v30, %v43_v3 }
  0xa4   :  { %v93_v54 = vadd.f32 %v92_v50, %v91_v46 }
  0xa5   :  { %v80_v35 = vadd.f32 %v79_v32, %v78_v29  ;;  %v82_v36 = vadd.f32 %v167_v30, %v81_v33  ;;  %v96_v38 = vsel %vm50_vm0, %v88_v34, 0.0 }
  0xa6   :  { %v97_v42 = vrot.slane %v96_v38, 4  ;;  %v94_v61 = vrot.slane %v93_v54, 1 }
  0xa7   :  { %168 = vrcp.f32 %v80_v35  ;;  %v83_v39 = vrot.slane %v82_v36, 2  ;;  %v114_v58 = vand.u32 2147483648, %v80_v35  ;;  %vm108_vm2 = vweird.f32 %v80_v35 }
  0xa8   :  { %v98_v47 = vadd.f32 %v97_v42, %v96_v38  ;;  %v112_v59 = vand.u32 2147483647, %v80_v35  ;;  %v95_v7 = vadd.f32 %v94_v61, %v93_v54 }
  0xa9   :  { %v84_v40 = vadd.f32 %v83_v39, %v82_v36  ;;  %v115_v3 = vor.u32 1.1754944e-38, %v114_v58 }
  0xaa   :  { %v99_v51 = vrot.slane %v98_v47, 2  ;;  %vm113_vm5 = vcmp.eq.f32.partialorder %v112_v59, 8.507059e+37 }
  0xab   :  { %v85_v43 = vrot.slane %v84_v40, 1 }
  0xac   :  { %v100_v55 = vadd.f32 %v99_v51, %v98_v47 }
  0xad   :  { %v169_v44 = vpop.eup %168  ;;  %v86_v45 = vadd.f32 %v85_v43, %v84_v40 }
  0xae   :  { %v104_v48 = vmul.f32 %v169_v44, %v80_v35  ;;  %vm109_vm1 = vweird.f32 %v169_v44  ;;  %v101_v62 = vrot.slane %v100_v55, 1 }
  0xaf   :  { %170 = vrcp.f32 %v86_v45  ;;  %vm110_vm3 = vmor %vm108_vm2, %vm109_vm1  ;;  %v128_v63 = vand.u32 2147483648, %v86_v45  ;;  %v126_v2 = vand.u32 2147483647, %v86_v45  ;;  %vm122_vm6 = vweird.f32 %v86_v45 }
  0xb0   :  { %v105_v49 = vsub.f32 1.0, %v104_v48  ;;  %v102_v8 = vadd.f32 %v101_v62, %v100_v55 }
  0xb1   :  { %v129_v6 = vor.u32 1.1754944e-38, %v128_v63  ;;  %vm127_vm8 = vcmp.eq.f32.partialorder %v126_v2, 8.507059e+37 }
  0xb2   :  { %v106_v52 = vmul.f32 %v169_v44, %v105_v49 }
  0xb4   :  { %v107_v56 = vadd.f32 %v169_v44, %v106_v52 }
  0xb5   :  { %v171_v53 = vpop.eup %170 }
  0xb6   :  { %v118_v57 = vmul.f32 %v171_v53, %v86_v45  ;;  %v111_v0 = vsel %vm110_vm3, %v169_v44, %v107_v56  ;;  %vm123_vm4 = vweird.f32 %v171_v53 }
  0xb7   :  { %v116_v5 = vsel %vm113_vm5, %v115_v3, %v111_v0  ;;  %vm124_vm7 = vmor %vm122_vm6, %vm123_vm4 }
  0xb8   :  { %v119_v60 = vsub.f32 1.0, %v118_v57  ;;  %v131_v11 = vmul.f32 %v116_v5, %v95_v7 }
  0xba   :  { %v120_v1 = vmul.f32 %v171_v53, %v119_v60 }
  0xbc   :  { %v121_v4 = vadd.f32 %v171_v53, %v120_v1 }
  0xbe   :  { %v125_v9 = vsel %vm124_vm7, %v171_v53, %v121_v4 }
  0xbf   :  { %v130_v10 = vsel %vm127_vm8, %v129_v6, %v125_v9 }
  0xc0   :  { %v132_v12 = vmul.f32 %v130_v10, %v102_v8 }
  0xc2   :  { %v136_v13 = vsel %vm135_vm9, %v132_v12, %v131_v11 }
  0xc3   :  { %139 = vst.msk [vmem:[#allocation7] sm:$0x3] %vm138_vm10, %v136_v13 }
  0xc4   :  { %150 = dma.vmem_to_hbm [thread:$0]  %s146_s1, 32, %s148_s23, [#allocation4]  }
  0xc5   :  { %248 = dma.done.wait [#allocation4], 32  }
  0xc6   :  { %249 = vsyncadd [#allocation4], 4294967264 }
  0xc7   :  { %155 = vsyncpa [#allocation3], 1 }
  0xc8   :  { %156 = vsyncpa [#allocation6], 1 }
  0xc9   :  { %157 = vsyncpa [#allocation4], 1 }

</bundles_post_ra>
